<compile_context>
chip_gen: v6e
topology: v6e:2x2x1
jax: 0.10.0
libtpu: 0.0.40
codegen_flags: <defaults>
</compile_context>

<pallas_src>
import jax
import jax.numpy as jnp
from jax.experimental import pallas as pl
from jax.experimental.pallas import tpu as pltpu

# ---- synthetic cfg (small, consistent with the module) ---------------------
C = 4                     # cfg.FPN.OUT_CHANNEL
RES = 4                   # cfg.ROI_BOX.RESOLUTION
HIDDEN = 32               # cfg.ROI_BOX.HIDDEN_DIM
NUM_CLASSES = 5           # cfg.ROI_BOX.NUM_CLASSES
IN_FEAT = C * RES * RES   # 64
NUM_OUT = NUM_CLASSES + NUM_CLASSES * 4   # 25 (cls ++ reg)

# lane/sublane padded dims
IN_FEAT_PAD = 128
HIDDEN_PAD = 128
OUT_PAD = 128

# RoI tile: multiple of 16 (bf16 sublane packing).  256 keeps the per-step
# VMEM footprint ~0.6 MiB (safe on v5e/v6e/v7x) while filling the MXU M dim.
# For large workloads the grid stays >= 2 so v7x megacore can shard it; this
# tiny demo only has one tile of real RoIs.
ROI_TILE = 256


# ---------------------------------------------------------------------------
# Pool glue (RoIAlign-like, single sample per bin at the bin center),
# expressed as two small interpolation matmuls per box (MXU-friendly, no
# scalar gathers).
# TODO(synk): full multi-level FPN RoIAlign with sampling_ratio > 1 is a
# data-dependent gather; a scalar-prefetch DMA-gather Pallas kernel would be
# needed for exact torchvision parity.
# ---------------------------------------------------------------------------
def _interp_matrix(coords, size):
    """coords: (RES,) sample positions along an axis of length `size`.
    Returns (RES, size) bilinear interpolation matrix."""
    c0 = jnp.floor(coords)
    i0 = jnp.clip(c0.astype(jnp.int32), 0, size - 1)
    i1 = jnp.clip(i0 + 1, 0, size - 1)
    frac = jnp.clip(coords - c0, 0.0, 1.0)
    grid = jnp.arange(size, dtype=jnp.int32)[None, :]          # (1, size)
    m = ((grid == i0[:, None]).astype(coords.dtype) * (1.0 - frac)[:, None]
         + (grid == i1[:, None]).astype(coords.dtype) * frac[:, None])
    return m


def roi_align_single_level(feat, boxes, resolution):
    """feat: (C, H, W) float32; boxes: (n, 4) [x1,y1,x2,y2] in feature coords.
    Returns (n, C, resolution, resolution)."""
    _, H, W = feat.shape

    def pool_one(box):
        x1, y1, x2, y2 = box[0], box[1], box[2], box[3]
        bw = jnp.maximum(x2 - x1, 1.0)
        bh = jnp.maximum(y2 - y1, 1.0)
        idx = jnp.arange(resolution, dtype=feat.dtype)
        xs = x1 + (idx + 0.5) * (bw / resolution)
        ys = y1 + (idx + 0.5) * (bh / resolution)
        Ly = _interp_matrix(ys, H)                              # (RES, H)
        Lx = _interp_matrix(xs, W)                              # (RES, W)
        # out[c, r, s] = sum_{h,w} Ly[r,h] feat[c,h,w] Lx[s,w]
        return jnp.einsum("rh,chw,sw->crs", Ly, feat, Lx)

    return jax.vmap(pool_one)(boxes)


# ---------------------------------------------------------------------------
# Pallas kernel: fused MLP head  (fc1+ReLU -> fc2+ReLU -> fused {cls | reg})
# ---------------------------------------------------------------------------
def roi_head_mlp_kernel(x_ref, w1_ref, w2_ref, wh_ref, bias_ref, out_ref):
    x = x_ref[...]                                        # (ROI_TILE, 128) bf16
    b1 = bias_ref[0:1, :]                                 # (1, 128) f32
    b2 = bias_ref[1:2, :]
    bh = bias_ref[2:3, :]

    h = jnp.dot(x, w1_ref[...], preferred_element_type=jnp.float32) + b1
    h = jnp.maximum(h, 0.0).astype(jnp.bfloat16)

    h = jnp.dot(h, w2_ref[...], preferred_element_type=jnp.float32) + b2
    h = jnp.maximum(h, 0.0).astype(jnp.bfloat16)

    out = jnp.dot(h, wh_ref[...], preferred_element_type=jnp.float32) + bh
    out_ref[...] = out.astype(out_ref.dtype)              # (ROI_TILE, 128) f32


def roi_head_mlp(x_pad, params):
    """x_pad: (n_pad, IN_FEAT_PAD) bf16, n_pad % ROI_TILE == 0.
    Returns fused output (n_pad, OUT_PAD) f32 (cols [0:25] are cls|reg)."""
    n_pad = x_pad.shape[0]
    assert n_pad % ROI_TILE == 0
    w1, w2, wh, bias = params["w1"], params["w2"], params["wh"], params["bias"]

    grid = (n_pad // ROI_TILE,)
    full = lambda i: (0, 0)   # weights / packed bias: same full block each step

    out = pl.pallas_call(
        roi_head_mlp_kernel,
        out_shape=jax.ShapeDtypeStruct((n_pad, OUT_PAD), jnp.float32),
        grid_spec=pltpu.PrefetchScalarGridSpec(
            num_scalar_prefetch=0,
            grid=grid,
            in_specs=[
                pl.BlockSpec((ROI_TILE, IN_FEAT_PAD), lambda i: (i, 0)),
                pl.BlockSpec(w1.shape, full),
                pl.BlockSpec(w2.shape, full),
                pl.BlockSpec(wh.shape, full),
                pl.BlockSpec(bias.shape, full),
            ],
            out_specs=pl.BlockSpec((ROI_TILE, OUT_PAD), lambda i: (i, 0)),
        ),
        compiler_params=pltpu.CompilerParams(
            dimension_semantics=("parallel",)),
    )(x_pad, w1, w2, wh, bias)
    return out


# ---------------------------------------------------------------------------
# Parameter init (matches the PyTorch __init__ semantics, deterministic),
# then zero-pad / fuse / cast for the TPU-friendly layout.
# ---------------------------------------------------------------------------
def init_params(key):
    k1, k2, k3, k4 = jax.random.split(key, 4)
    # kaiming_normal_(a=1): gain = sqrt(2/(1+a^2)) = 1 -> std = 1/sqrt(fan_in)
    w1 = jax.random.normal(k1, (HIDDEN, IN_FEAT), jnp.float32) / jnp.sqrt(IN_FEAT)
    w2 = jax.random.normal(k2, (HIDDEN, HIDDEN), jnp.float32) / jnp.sqrt(HIDDEN)
    wc = jax.random.normal(k3, (NUM_CLASSES, HIDDEN), jnp.float32) * 0.01
    wr = jax.random.normal(k4, (NUM_CLASSES * 4, HIDDEN), jnp.float32) * 0.001
    b1 = jnp.zeros((HIDDEN,), jnp.float32)
    b2 = jnp.zeros((HIDDEN,), jnp.float32)
    bc = jnp.zeros((NUM_CLASSES,), jnp.float32)
    br = jnp.zeros((NUM_CLASSES * 4,), jnp.float32)

    # transpose to (in, out), fuse heads, zero-pad to lane-dense shapes
    w1_p = jnp.zeros((IN_FEAT_PAD, HIDDEN_PAD), jnp.float32)
    w1_p = w1_p.at[:IN_FEAT, :HIDDEN].set(w1.T)
    w2_p = jnp.zeros((HIDDEN_PAD, HIDDEN_PAD), jnp.float32)
    w2_p = w2_p.at[:HIDDEN, :HIDDEN].set(w2.T)
    wh_p = jnp.zeros((HIDDEN_PAD, OUT_PAD), jnp.float32)
    wh_p = wh_p.at[:HIDDEN, :NUM_OUT].set(jnp.concatenate([wc.T, wr.T], axis=1))

    # single packed bias block: row0=b1, row1=b2, row2=(bc|br), rest zero
    bias = jnp.zeros((8, 128), jnp.float32)
    bias = bias.at[0, :HIDDEN].set(b1)
    bias = bias.at[1, :HIDDEN].set(b2)
    bias = bias.at[2, :NUM_OUT].set(jnp.concatenate([bc, br], axis=0))

    return {
        "w1": w1_p.astype(jnp.bfloat16),
        "w2": w2_p.astype(jnp.bfloat16),
        "wh": wh_p.astype(jnp.bfloat16),
        "bias": bias,   # f32, added to the f32 accumulator
    }


# ---------------------------------------------------------------------------
# Full RoIHead forward
# ---------------------------------------------------------------------------
def roi_head_forward(features, proposals, params):
    """features: list[(N, C, H, W)], proposals: list[(n_i, 4)].
    Returns (logits (num, NUM_CLASSES), bbox_regs (num, NUM_CLASSES*4))."""
    pooled = []
    for feat, boxes in zip(features, proposals):
        # single image per level in this synthetic setup (batch index 0)
        pooled.append(roi_align_single_level(feat[0], boxes, RES))
    x = jnp.concatenate(pooled, axis=0)                  # (num, C, RES, RES)
    num = x.shape[0]
    x = x.reshape(num, -1)                               # (num, IN_FEAT)

    n_pad = pl.cdiv(num, ROI_TILE) * ROI_TILE
    x_pad = jnp.pad(x, ((0, n_pad - num), (0, IN_FEAT_PAD - IN_FEAT)))
    x_pad = x_pad.astype(jnp.bfloat16)

    out = roi_head_mlp(x_pad, params)                    # (n_pad, 128) f32
    logits = out[:num, :NUM_CLASSES]
    bbox_regs = out[:num, NUM_CLASSES:NUM_CLASSES + NUM_CLASSES * 4]
    return logits, bbox_regs


if __name__ == "__main__":
    key = jax.random.PRNGKey(0)
    k_feat, k_box, k_par = jax.random.split(key, 3)

    # one FPN level, batch=1, C=4, 16x16 feature map
    features = [jax.random.normal(k_feat, (1, C, 16, 16), jnp.float32)]

    # 6 proposals: [x1, y1, x2, y2] in feature-map coordinates
    kb1, kb2 = jax.random.split(k_box)
    xy1 = jax.random.uniform(kb1, (6, 2), jnp.float32, 0.0, 8.0)
    wh = jax.random.uniform(kb2, (6, 2), jnp.float32, 2.0, 7.0)
    boxes = jnp.concatenate([xy1, xy1 + wh], axis=-1)
    proposals = [boxes]

    params = init_params(k_par)

    logits, bbox_regs = roi_head_forward(features, proposals, params)
    jax.block_until_ready((logits, bbox_regs))

    assert logits.shape == (6, NUM_CLASSES)
    assert bbox_regs.shape == (6, NUM_CLASSES * 4)
    assert jnp.all(jnp.isfinite(logits)) and jnp.all(jnp.isfinite(bbox_regs))
    print("KERNEL_OK")
</pallas_src>

<mosaic_0001>
module attributes {stable_mosaic.version = 11 : i64} {
  func.func @roi_head_mlp_kernel(%arg0: i32, %arg1: memref<256x128xbf16, #tpu.memory_space<vmem>>, %arg2: memref<128x128xbf16, #tpu.memory_space<vmem>>, %arg3: memref<128x128xbf16, #tpu.memory_space<vmem>>, %arg4: memref<128x128xbf16, #tpu.memory_space<vmem>>, %arg5: memref<8x128xf32, #tpu.memory_space<vmem>>, %arg6: memref<256x128xf32, #tpu.memory_space<vmem>>) attributes {dimension_semantics = [#tpu.dimension_semantics<parallel>], iteration_bounds = array<i64: 1>, scalar_prefetch = 0 : i64, scratch_operands = 0 : i64, tpu.core_type = #tpu.core_type<tc>, window_params = [{transform_indices = @transform_0, window_bounds = array<i64: 256, 128>}, {pipeline_mode = #tpu.pipeline_mode<synchronous>, transform_indices = @transform_1, window_bounds = array<i64: 128, 128>}, {pipeline_mode = #tpu.pipeline_mode<synchronous>, transform_indices = @transform_2, window_bounds = array<i64: 128, 128>}, {pipeline_mode = #tpu.pipeline_mode<synchronous>, transform_indices = @transform_3, window_bounds = array<i64: 128, 128>}, {pipeline_mode = #tpu.pipeline_mode<synchronous>, transform_indices = @transform_4, window_bounds = array<i64: 8, 128>}, {transform_indices = @transform_5, window_bounds = array<i64: 256, 128>}]} {
    %c0 = arith.constant 0 : index
    %c0_0 = arith.constant 0 : index
    %0 = vector.load %arg1[%c0, %c0_0] : memref<256x128xbf16, #tpu.memory_space<vmem>>, vector<256x128xbf16>
    %c0_1 = arith.constant 0 : index
    %c0_2 = arith.constant 0 : index
    %1 = vector.load %arg5[%c0_1, %c0_2] : memref<8x128xf32, #tpu.memory_space<vmem>>, vector<1x128xf32>
    %c1 = arith.constant 1 : index
    %c0_3 = arith.constant 0 : index
    %2 = vector.load %arg5[%c1, %c0_3] : memref<8x128xf32, #tpu.memory_space<vmem>>, vector<1x128xf32>
    %c2 = arith.constant 2 : index
    %c0_4 = arith.constant 0 : index
    %3 = vector.load %arg5[%c2, %c0_4] : memref<8x128xf32, #tpu.memory_space<vmem>>, vector<1x128xf32>
    %c0_5 = arith.constant 0 : index
    %c0_6 = arith.constant 0 : index
    %4 = vector.load %arg2[%c0_5, %c0_6] : memref<128x128xbf16, #tpu.memory_space<vmem>>, vector<128x128xbf16>
    %cst = arith.constant dense<0.000000e+00> : vector<256x128xf32>
    %5 = tpu.matmul %0, %4, %cst {dimension_numbers = #tpu.dot_dimension_numbers<[1], [0], [0], [1], [0, 0, 1, 1], [], []>} : vector<256x128xbf16>, vector<128x128xbf16>, vector<256x128xf32> -> vector<256x128xf32>
    %6 = vector.broadcast %1 : vector<1x128xf32> to vector<256x128xf32>
    %7 = arith.addf %5, %6 : vector<256x128xf32>
    %cst_7 = arith.constant 0.000000e+00 : f32
    %8 = vector.broadcast %cst_7 : f32 to vector<256x128xf32>
    %9 = arith.maximumf %7, %8 : vector<256x128xf32>
    %10 = arith.truncf %9 : vector<256x128xf32> to vector<256x128xbf16>
    %c0_8 = arith.constant 0 : index
    %c0_9 = arith.constant 0 : index
    %11 = vector.load %arg3[%c0_8, %c0_9] : memref<128x128xbf16, #tpu.memory_space<vmem>>, vector<128x128xbf16>
    %cst_10 = arith.constant dense<0.000000e+00> : vector<256x128xf32>
    %12 = tpu.matmul %10, %11, %cst_10 {dimension_numbers = #tpu.dot_dimension_numbers<[1], [0], [0], [1], [0, 0, 1, 1], [], []>} : vector<256x128xbf16>, vector<128x128xbf16>, vector<256x128xf32> -> vector<256x128xf32>
    %13 = vector.broadcast %2 : vector<1x128xf32> to vector<256x128xf32>
    %14 = arith.addf %12, %13 : vector<256x128xf32>
    %cst_11 = arith.constant 0.000000e+00 : f32
    %15 = vector.broadcast %cst_11 : f32 to vector<256x128xf32>
    %16 = arith.maximumf %14, %15 : vector<256x128xf32>
    %17 = arith.truncf %16 : vector<256x128xf32> to vector<256x128xbf16>
    %c0_12 = arith.constant 0 : index
    %c0_13 = arith.constant 0 : index
    %18 = vector.load %arg4[%c0_12, %c0_13] : memref<128x128xbf16, #tpu.memory_space<vmem>>, vector<128x128xbf16>
    %cst_14 = arith.constant dense<0.000000e+00> : vector<256x128xf32>
    %19 = tpu.matmul %17, %18, %cst_14 {dimension_numbers = #tpu.dot_dimension_numbers<[1], [0], [0], [1], [0, 0, 1, 1], [], []>} : vector<256x128xbf16>, vector<128x128xbf16>, vector<256x128xf32> -> vector<256x128xf32>
    %20 = vector.broadcast %3 : vector<1x128xf32> to vector<256x128xf32>
    %21 = arith.addf %19, %20 : vector<256x128xf32>
    %c0_15 = arith.constant 0 : index
    %c0_16 = arith.constant 0 : index
    %22 = vector.load %arg6[%c0_15, %c0_16] : memref<256x128xf32, #tpu.memory_space<vmem>>, vector<256x128xf32>
    tpu.vector_store %arg6[%c0_15, %c0_16], %21 {strides = array<i32>} : memref<256x128xf32, #tpu.memory_space<vmem>>, vector<256x128xf32>,
    return
  }
  func.func @transform_0(%arg0: i32) -> (i32, i32) {
    %c0_i32 = arith.constant 0 : i32
    %c0_i32_0 = arith.constant 0 : i32
    return %arg0, %c0_i32 : i32, i32
  }
  func.func @transform_1(%arg0: i32) -> (i32, i32) {
    %c0_i32 = arith.constant 0 : i32
    %c0_i32_0 = arith.constant 0 : i32
    %c0_i32_1 = arith.constant 0 : i32
    return %c0_i32, %c0_i32_0 : i32, i32
  }
  func.func @transform_2(%arg0: i32) -> (i32, i32) {
    %c0_i32 = arith.constant 0 : i32
    %c0_i32_0 = arith.constant 0 : i32
    %c0_i32_1 = arith.constant 0 : i32
    return %c0_i32, %c0_i32_0 : i32, i32
  }
  func.func @transform_3(%arg0: i32) -> (i32, i32) {
    %c0_i32 = arith.constant 0 : i32
    %c0_i32_0 = arith.constant 0 : i32
    %c0_i32_1 = arith.constant 0 : i32
    return %c0_i32, %c0_i32_0 : i32, i32
  }
  func.func @transform_4(%arg0: i32) -> (i32, i32) {
    %c0_i32 = arith.constant 0 : i32
    %c0_i32_0 = arith.constant 0 : i32
    %c0_i32_1 = arith.constant 0 : i32
    return %c0_i32, %c0_i32_0 : i32, i32
  }
  func.func @transform_5(%arg0: i32) -> (i32, i32) {
    %c0_i32 = arith.constant 0 : i32
    %c0_i32_0 = arith.constant 0 : i32
    return %arg0, %c0_i32 : i32, i32
  }
}

</mosaic_0001>

<bundles_post_ra>
// kernel: tpu_custom_call.1
= control target key start
LH: loop header
LB: loop body
LE: loop exit
PB: predicated region body
PF: predicated region fallthrough
CT: control target
= control target key end

     0   :  { %10 = vsyncpa [#allocation3], 0  ;;  %s1693_s0 = inlined_call_operand.hbm [shape: bf16[256,128], index: 0, kind: input, shape index: {}]   ;;  %s1694_s1 = inlined_call_operand.hbm [shape: bf16[128,128], index: 1, kind: input, shape index: {}]   ;;  %s1695_s2 = inlined_call_operand.hbm [shape: bf16[128,128], index: 2, kind: input, shape index: {}]   ;;  %s1696_s3 = inlined_call_operand.hbm [shape: bf16[128,128], index: 3, kind: input, shape index: {}]   ;;  %s1697_s4 = inlined_call_operand.hbm [shape: f32[8,128], index: 4, kind: input, shape index: {}]   ;;  %s1698_s5 = inlined_call_operand.hbm [shape: f32[256,128], index: 5, kind: output, shape index: {}]  }
   0x1   :  { %11 = vsyncpa [#allocation6], 0 }
   0x2   :  { %12 = vsyncpa [#allocation9], 0 }
   0x3   :  { %13 = vsyncpa [#allocation4], 0  ;;  %s1506_s18 = smov [#allocation5]   ;;  %s1507_s20 = smov [#allocation8]  }
   0x4   :  { %s31_s19 = sshll.u32 %s1506_s18, 4  ;;  %s55_s21 = sshll.u32 %s1507_s20, 4  ;;  %s32_s19 = int_to_ptr.vmem [resolvable:$true] %s31_s19  ;;  %s56_s21 = int_to_ptr.vmem [resolvable:$true] %s55_s21 }
   0x5   :  { %s1386_s22 = scalar_lea.vmem %s32_s19, 1024  ;;  %p1391_p1 = scmp.lt.s32.totalorder %s32_s19, %s32_s19 }
   0x6   :  { %p1387_p0 = scmp.ne.s32.totalorder %s32_s19, %s1386_s22  ;;  %p1392_p2 = scmp.lt.s32.totalorder %s1386_s22, %s1386_s22 }
   0x8   :  { %p1393_p3 = por %p1392_p2, %p1391_p1 }
   0xa   :  { %p1394_p4 = pnand %p1393_p3, %p1387_p0 }
   0xc   :  { %1397 = shalt.err (!%p1394_p4)
}
   0xd   :  { %s1508_s23 = smov 64   ;;  %s1509_s24 = smov 4  }
   0xe   :  { %37 = dma.hbm_to_vmem [thread:$0]  %s1694_s1, 1024, %s32_s19, [#allocation6], %s1508_s23, %s1508_s23, %s1509_s24  }
   0xf   :  { %s1406_s27 = scalar_lea.vmem %s56_s21, 1024  ;;  %p1411_p6 = scmp.lt.s32.totalorder %s56_s21, %s56_s21 }
  0x10   :  { %p1407_p5 = scmp.ne.s32.totalorder %s56_s21, %s1406_s27  ;;  %p1412_p7 = scmp.lt.s32.totalorder %s1406_s27, %s1406_s27 }
  0x12   :  { %p1413_p8 = por %p1412_p7, %p1411_p6 }
  0x14   :  { %p1414_p9 = pnand %p1413_p8, %p1407_p5 }
  0x16   :  { %1417 = shalt.err (!%p1414_p9)
}
  0x17   :  { %61 = dma.hbm_to_vmem [thread:$0]  %s1696_s3, 1024, %s56_s21, [#allocation9], %s1508_s23, %s1508_s23, %s1509_s24  }
  0x18   :  { %s1510_s30 = smov [#allocation2]   ;;  %s1511_s7 = smov [#allocation7]  }
  0x19   :  { %s19_s6 = sshll.u32 %s1510_s30, 4  ;;  %s43_s8 = sshll.u32 %s1511_s7, 4  ;;  %s20_s6 = int_to_ptr.vmem [resolvable:$true] %s19_s6  ;;  %s44_s8 = int_to_ptr.vmem [resolvable:$true] %s43_s8 }
  0x1a   :  { %s1426_s1 = scalar_lea.vmem %s20_s6, 2048  ;;  %p1431_p11 = scmp.lt.s32.totalorder %s20_s6, %s20_s6 }
  0x1b   :  { %p1427_p10 = scmp.ne.s32.totalorder %s20_s6, %s1426_s1  ;;  %p1432_p12 = scmp.lt.s32.totalorder %s1426_s1, %s1426_s1 }
  0x1d   :  { %p1433_p13 = por %p1432_p12, %p1431_p11 }
  0x1f   :  { %p1434_p0 = pnand %p1433_p13, %p1427_p10 }
  0x21   :  { %1437 = shalt.err (!%p1434_p0)
}
  0x22   :  { %25 = dma.hbm_to_vmem [thread:$0]  %s1693_s0, 2048, %s20_s6, [#allocation3], %s1508_s23, %s1508_s23, %s1509_s24  }
  0x23   :  { %s1446_s3 = scalar_lea.vmem %s44_s8, 1024  ;;  %p1451_p2 = scmp.lt.s32.totalorder %s44_s8, %s44_s8 }
  0x24   :  { %p1447_p1 = scmp.ne.s32.totalorder %s44_s8, %s1446_s3  ;;  %p1452_p3 = scmp.lt.s32.totalorder %s1446_s3, %s1446_s3 }
  0x26   :  { %p1453_p4 = por %p1452_p3, %p1451_p2 }
  0x28   :  { %p1454_p5 = pnand %p1453_p4, %p1447_p1 }
  0x2a   :  { %1457 = shalt.err (!%p1454_p5)
}
  0x2b   :  { %49 = dma.hbm_to_vmem [thread:$0]  %s1695_s2, 1024, %s44_s8, [#allocation6], %s1508_s23, %s1508_s23, %s1509_s24  }
  0x2c   :  { %s1512_s13 = smov [#allocation10]  }
  0x2d   :  { %s68_s14 = sshll.u32 %s1512_s13, 4  ;;  %s69_s14 = int_to_ptr.vmem [resolvable:$true] %s68_s14 }
  0x2e   :  { %s1466_s15 = scalar_lea.vmem %s69_s14, 128  ;;  %p1471_p7 = scmp.lt.s32.totalorder %s69_s14, %s69_s14 }
  0x2f   :  { %p1467_p6 = scmp.ne.s32.totalorder %s69_s14, %s1466_s15  ;;  %p1472_p8 = scmp.lt.s32.totalorder %s1466_s15, %s1466_s15 }
  0x31   :  { %p1473_p9 = por %p1472_p8, %p1471_p7 }
  0x33   :  { %p1474_p10 = pnand %p1473_p9, %p1467_p6 }
  0x35   :  { %1477 = shalt.err (!%p1474_p10)
}
  0x36   :  { %71 = dma.hbm_to_vmem [thread:$0]  %s1697_s4, 128, %s69_s14, [#allocation9]  }
  0x37   :  { %1498 = dma.done.wait [#allocation3], 2048  }
  0x38   :  { %1499 = vsyncadd [#allocation3], 4294965248 }
  0x39   :  { %1500 = dma.done.wait [#allocation6], 2048  }
  0x3a   :  { %1501 = vsyncadd [#allocation6], 4294965248 }
  0x3b   :  { %1502 = dma.done.wait [#allocation9], 1152  }
  0x3c   :  { %1503 = vsyncadd [#allocation9], 4294966144  ;;  %v1338_v0 = vld [vmem:[#allocation5 + $0x38] sm:$0xff]   ;;  %v1339_v1 = vld [vmem:[#allocation5 + $0x30] sm:$0xff]   ;;  %s1513_s2 = smov [#allocation11]  }
  0x3d   :  { %1168 = vmatprep.subr.bf16.mxu0 %v1338_v0  ;;  %1312 = vmatprep.subr.bf16.mxu1 %v1338_v0  ;;  %v1340_v2 = vld [vmem:[#allocation5 + $0x28] sm:$0xff]   ;;  %v1341_v3 = vld [vmem:[#allocation5 + $0x20] sm:$0xff]   ;;  %v1342_v5 = vld [vmem:[#allocation5 + $0x18] sm:$0xff]   ;;  %s1039_s4 = sshll.u32 %s1513_s2, 4  ;;  %s1040_s4 = int_to_ptr.vmem [resolvable:$true] %s1039_s4 }
  0x3e   :  { %1169 = vmatpush3.bf16.msra.mxu0 %v1338_v0  ;;  %1320 = vmatpush3.bf16.msra.mxu1 %v1338_v0  ;;  %v1346_v4 = vld [vmem:[#allocation2] sm:$0xff]   ;;  %v1343_v6 = vld [vmem:[#allocation5 + $0x10] sm:$0xff]   ;;  %v1344_v8 = vld [vmem:[#allocation5 + $0x8] sm:$0xff]   ;;  %s1478_s17 = scalar_lea.vmem %s1040_s4, 4096  ;;  %p1483_p12 = scmp.lt.s32.totalorder %s1040_s4, %s1040_s4 }
  0x3f   :  { %1170 = vmatprep.subr.bf16.mxu0 %v1339_v1  ;;  %1313 = vmatprep.subr.bf16.mxu1 %v1339_v1  ;;  %v1354_v7 = vld [vmem:[#allocation2 + $0x40] sm:$0xff]   ;;  %v1347_v10 = vld [vmem:[#allocation2 + $0x8] sm:$0xff]   ;;  %v1362_v12 = vld [vmem:[#allocation7 + $0x38] sm:$0xff]   ;;  %p1479_p11 = scmp.ne.s32.totalorder %s1040_s4, %s1478_s17  ;;  %p1484_p13 = scmp.lt.s32.totalorder %s1478_s17, %s1478_s17 }
  0x40   :  { %1184 = vmatprep.mubr.bf16.mxu0 %v1346_v4  ;;  %1200 = vmatprep.mubr.bf16.mxu1 %v1354_v7  ;;  %v1345_v9 = vld [vmem:[#allocation5] sm:$0xff]   ;;  %v1355_v11 = vld [vmem:[#allocation2 + $0x48] sm:$0xff]   ;;  %v1348_v13 = vld [vmem:[#allocation2 + $0x10] sm:$0xff]  }
  0x41   :  { %v1356_v14 = vld [vmem:[#allocation2 + $0x50] sm:$0xff]   ;;  %v1364_v16 = vld [vmem:[#allocation7 + $0x28] sm:$0xff]   ;;  %v1349_v17 = vld [vmem:[#allocation2 + $0x18] sm:$0xff]   ;;  %p1485_p0 = por %p1484_p13, %p1483_p12 }
  0x42   :  { %1171 = vmatpush3.bf16.msra.mxu0 %v1339_v1  ;;  %1321 = vmatpush3.bf16.msra.mxu1 %v1339_v1  ;;  %v1363_v15 = vld [vmem:[#allocation7 + $0x30] sm:$0xff]   ;;  %v1357_v18 = vld [vmem:[#allocation2 + $0x58] sm:$0xff]   ;;  %v1350_v19 = vld [vmem:[#allocation2 + $0x20] sm:$0xff]  }
  0x43   :  { %1172 = vmatprep.subr.bf16.mxu0 %v1340_v2  ;;  %1314 = vmatprep.subr.bf16.mxu1 %v1340_v2  ;;  %v1358_v20 = vld [vmem:[#allocation2 + $0x60] sm:$0xff]   ;;  %v1366_v22 = vld [vmem:[#allocation7 + $0x18] sm:$0xff]   ;;  %v1351_v23 = vld [vmem:[#allocation2 + $0x28] sm:$0xff]   ;;  %p1486_p1 = pnand %p1485_p0, %p1479_p11 }
  0x44   :  { %v1365_v21 = vld [vmem:[#allocation7 + $0x20] sm:$0xff]   ;;  %v1359_v24 = vld [vmem:[#allocation2 + $0x68] sm:$0xff]   ;;  %v1352_v25 = vld [vmem:[#allocation2 + $0x30] sm:$0xff]  }
  0x45   :  { %v1360_v26 = vld [vmem:[#allocation2 + $0x70] sm:$0xff]   ;;  %v1353_v27 = vld [vmem:[#allocation2 + $0x38] sm:$0xff]   ;;  %v1368_v30 = vld [vmem:[#allocation7 + $0x8] sm:$0xff]  }
  0x46   :  { %1173 = vmatpush3.bf16.msra.mxu0 %v1340_v2  ;;  %1322 = vmatpush3.bf16.msra.mxu1 %v1340_v2  ;;  %v1361_v28 = vld [vmem:[#allocation2 + $0x78] sm:$0xff]   ;;  %v1367_v29 = vld [vmem:[#allocation7 + $0x10] sm:$0xff]   ;;  %v1369_v31 = vld [vmem:[#allocation7] sm:$0xff]  }
  0x47   :  { %1174 = vmatprep.subr.bf16.mxu0 %v1341_v3  ;;  %1315 = vmatprep.subr.bf16.mxu1 %v1341_v3  ;;  %v1370_v32 = vld [vmem:[#allocation8 + $0x38] sm:$0xff]   ;;  %v1371_v33 = vld [vmem:[#allocation8 + $0x30] sm:$0xff]   ;;  %v1372_v34 = vld [vmem:[#allocation8 + $0x28] sm:$0xff]  }
  0x48   :  { %v1373_v35 = vld [vmem:[#allocation8 + $0x20] sm:$0xff]   ;;  %v1374_v36 = vld [vmem:[#allocation8 + $0x18] sm:$0xff]  }
  0x49   :  { %v1575_v41 = vld [vmem:[#allocation10] ss:$0 sm:$0xff] }
  0x4a   :  { %1175 = vmatpush3.bf16.msra.mxu0 %v1341_v3  ;;  %1323 = vmatpush3.bf16.msra.mxu1 %v1341_v3 }
  0x4b   :  { %1176 = vmatprep.subr.bf16.mxu0 %v1342_v5  ;;  %1316 = vmatprep.subr.bf16.mxu1 %v1342_v5 }
  0x4e   :  { %1177 = vmatpush3.bf16.msra.mxu0 %v1342_v5  ;;  %1324 = vmatpush3.bf16.msra.mxu1 %v1342_v5 }
  0x4f   :  { %1178 = vmatprep.subr.bf16.mxu0 %v1343_v6  ;;  %1317 = vmatprep.subr.bf16.mxu1 %v1343_v6 }
  0x52   :  { %1179 = vmatpush3.bf16.msra.mxu0 %v1343_v6  ;;  %1325 = vmatpush3.bf16.msra.mxu1 %v1343_v6 }
  0x53   :  { %1180 = vmatprep.subr.bf16.mxu0 %v1344_v8  ;;  %1318 = vmatprep.subr.bf16.mxu1 %v1344_v8 }
  0x56   :  { %1181 = vmatpush3.bf16.msra.mxu0 %v1344_v8  ;;  %1326 = vmatpush3.bf16.msra.mxu1 %v1344_v8 }
  0x57   :  { %1182 = vmatprep.subr.bf16.mxu0 %v1345_v9  ;;  %1319 = vmatprep.subr.bf16.mxu1 %v1345_v9 }
  0x5a   :  { %1183 = vmatpush3.bf16.msra.mxu0 %v1345_v9  ;;  %1327 = vmatpush3.bf16.msra.mxu1 %v1345_v9 }
  0x5b   :  { %1216 = vmatprep.subr.bf16.mxu1 %v1362_v12  ;;  %1264 = vmatprep.subr.bf16.mxu0 %v1370_v32 }
  0x5d   :  { %1185 = vmatmul.mubr.bf16.vlgmr.msra.gmra.mxu0 %v1347_v10  ;;  %1201 = vmatmul.mubr.bf16.vlgmr.msra.gmra.mxu1 %v1355_v11 }
  0x5e   :  { %1188 = vmatprep.mubr.bf16.mxu0 %v1348_v13  ;;  %1204 = vmatprep.mubr.bf16.mxu1 %v1356_v14 }
  0x5f   :  { %1217 = vmatpush3.bf16.msra.mxu1 %v1362_v12  ;;  %1265 = vmatpush3.bf16.msra.mxu0 %v1370_v32 }
  0x60   :  { %1218 = vmatprep.subr.bf16.mxu1 %v1363_v15  ;;  %1266 = vmatprep.subr.bf16.mxu0 %v1371_v33 }
  0x63   :  { %1219 = vmatpush3.bf16.msra.mxu1 %v1363_v15  ;;  %1267 = vmatpush3.bf16.msra.mxu0 %v1371_v33 }
  0x64   :  { %1220 = vmatprep.subr.bf16.mxu1 %v1364_v16  ;;  %1268 = vmatprep.subr.bf16.mxu0 %v1372_v34 }
  0x65   :  { %1189 = vmatmul.mubr.bf16.gmra.mxu0 %v1349_v17  ;;  %1205 = vmatmul.mubr.bf16.gmra.mxu1 %v1357_v18 }
  0x66   :  { %1192 = vmatprep.mubr.bf16.mxu0 %v1350_v19  ;;  %1208 = vmatprep.mubr.bf16.mxu1 %v1358_v20 }
  0x67   :  { %1221 = vmatpush3.bf16.msra.mxu1 %v1364_v16  ;;  %1269 = vmatpush3.bf16.msra.mxu0 %v1372_v34 }
  0x68   :  { %1222 = vmatprep.subr.bf16.mxu1 %v1365_v21  ;;  %1270 = vmatprep.subr.bf16.mxu0 %v1373_v35 }
  0x6b   :  { %1223 = vmatpush3.bf16.msra.mxu1 %v1365_v21  ;;  %1271 = vmatpush3.bf16.msra.mxu0 %v1373_v35 }
  0x6c   :  { %1224 = vmatprep.subr.bf16.mxu1 %v1366_v22  ;;  %1272 = vmatprep.subr.bf16.mxu0 %v1374_v36 }
  0x6d   :  { %1193 = vmatmul.mubr.bf16.gmra.mxu0 %v1351_v23  ;;  %1209 = vmatmul.mubr.bf16.gmra.mxu1 %v1359_v24 }
  0x6e   :  { %1196 = vmatprep.mubr.bf16.mxu0 %v1352_v25  ;;  %1212 = vmatprep.mubr.bf16.mxu1 %v1360_v26 }
  0x6f   :  { %1225 = vmatpush3.bf16.msra.mxu1 %v1366_v22  ;;  %1273 = vmatpush3.bf16.msra.mxu0 %v1374_v36 }
  0x70   :  { %1226 = vmatprep.subr.bf16.mxu1 %v1367_v29 }
  0x73   :  { %1227 = vmatpush3.bf16.msra.mxu1 %v1367_v29 }
  0x74   :  { %1228 = vmatprep.subr.bf16.mxu1 %v1368_v30 }
  0x75   :  { %1197 = vmatmul.mubr.bf16.gmra.mxu0 %v1353_v27  ;;  %1213 = vmatmul.mubr.bf16.gmra.mxu1 %v1361_v28 }
  0x77   :  { %1229 = vmatpush3.bf16.msra.mxu1 %v1368_v30 }
  0x78   :  { %1230 = vmatprep.subr.bf16.mxu1 %v1369_v31 }
  0x7b   :  { %1231 = vmatpush3.bf16.msra.mxu1 %v1369_v31 }
 0x11d   :  { %v1186_v37 = vpop.f32.mrf.mxu0  ;;  %v1573_v38 = vpop.f32.mrf.mxu1 }
 0x11e   :  { %v330_v46 = vadd.f32 %v1186_v37, %v1575_v41 }
 0x11f   :  { %v321_v39 = vpop.f32.mrf.mxu0  ;;  %v385_v40 = vpop.f32.mrf.mxu1 }
 0x120   :  { %v322_v44 = vadd.f32 %v1575_v41, %v321_v39  ;;  %v450_v55 = vmax.f32 %v330_v46, 0.0  ;;  %v386_v27 = vadd.f32 %v1575_v41, %v385_v40 }
 0x121   :  { %v1187_v42 = vpop.f32.mrf.mxu0  ;;  %v1577_v43 = vpop.f32.mrf.mxu1 }
 0x122   :  { %v333_v45 = vadd.f32 %v1187_v42, %v1575_v41  ;;  %v448_v53 = vmax.f32 %v322_v44, 0.0  ;;  %v464_v36 = vmax.f32 %v386_v27, 0.0 }
 0x123   :  { %v324_v47 = vpop.f32.mrf.mxu0  ;;  %v388_v48 = vpop.f32.mrf.mxu1 }
 0x124   :  { %v325_v49 = vadd.f32 %v1575_v41, %v324_v47  ;;  %v451_v50 = vmax.f32 %v333_v45, 0.0  ;;  %v389_v28 = vadd.f32 %v1575_v41, %v388_v48 }
 0x125   :  { %v1190_v51 = vpop.f32.mrf.mxu0  ;;  %v1583_v52 = vpop.f32.mrf.mxu1 }
 0x126   :  { %v449_v54 = vmax.f32 %v325_v49, 0.0  ;;  %v481_v59 = vpack.c.bf16 %v451_v50, %v450_v55  ;;  %v346_v0 = vadd.f32 %v1190_v51, %v1575_v41  ;;  %v465_v39 = vmax.f32 %v389_v28, 0.0  ;;  %v1622_v28 = vld [vmem:[#allocation10 + $0x1] ss:$0 sm:$0xff] }
 0x127   :  { %v337_v56 = vpop.f32.mrf.mxu0  ;;  %v401_v57 = vpop.f32.mrf.mxu1  ;;  %v394_v51 = vadd.f32 %v1573_v38, %v1575_v41  ;;  %v410_v38 = vadd.f32 %v1583_v52, %v1575_v41 }
 0x128   :  { %v480_v58 = vpack.c.bf16 %v449_v54, %v448_v53  ;;  %v338_v62 = vadd.f32 %v1575_v41, %v337_v56  ;;  %v454_v8 = vmax.f32 %v346_v0, 0.0  ;;  %v488_v48 = vpack.c.bf16 %v465_v39, %v464_v36 }
 0x129   :  { %v1191_v60 = vpop.f32.mrf.mxu0  ;;  %v1585_v61 = vpop.f32.mrf.mxu1  ;;  %v402_v49 = vadd.f32 %v1575_v41, %v401_v57  ;;  %v397_v54 = vadd.f32 %v1577_v43, %v1575_v41 }
 0x12a   :  { %v349_v63 = vadd.f32 %v1191_v60, %v1575_v41  ;;  %1232 = vmatprep.mubr.bf16.mxu1 %v480_v58  ;;  %v452_v6 = vmax.f32 %v338_v62, 0.0  ;;  %v413_v43 = vadd.f32 %v1585_v61, %v1575_v41 }
 0x12b   :  { %v340_v1 = vpop.f32.mrf.mxu0  ;;  %1233 = vmatmul.mubr.bf16.vlgmr.msra.gmra.mxu1 %v481_v59  ;;  %v404_v5 = vpop.f32.mrf.mxu1  ;;  %v468_v56 = vmax.f32 %v402_v49, 0.0  ;;  %v466_v59 = vmax.f32 %v394_v51, 0.0  ;;  %v467_v60 = vmax.f32 %v397_v54, 0.0 }
 0x12c   :  { %v341_v2 = vadd.f32 %v1575_v41, %v340_v1  ;;  %v455_v3 = vmax.f32 %v349_v63, 0.0  ;;  %v405_v50 = vadd.f32 %v1575_v41, %v404_v5  ;;  %v470_v5 = vmax.f32 %v410_v38, 0.0 }
 0x12d   :  { %v1194_v4 = vpop.f32.mrf.mxu0  ;;  %v1591_v13 = vpop.f32.mrf.mxu1  ;;  %v489_v1 = vpack.c.bf16 %v467_v60, %v466_v59 }
 0x12e   :  { %v453_v7 = vmax.f32 %v341_v2, 0.0  ;;  %v483_v11 = vpack.c.bf16 %v455_v3, %v454_v8  ;;  %v362_v16 = vadd.f32 %v1194_v4, %v1575_v41  ;;  %v469_v58 = vmax.f32 %v405_v50, 0.0 }
 0x12f   :  { %v353_v9 = vpop.f32.mrf.mxu0  ;;  %v417_v21 = vpop.f32.mrf.mxu1  ;;  %v426_v52 = vadd.f32 %v1591_v13, %v1575_v41  ;;  %v1375_v13 = vld [vmem:[#allocation8 + $0x10] sm:$0xff]  }
 0x130   :  { %v482_v10 = vpack.c.bf16 %v453_v7, %v452_v6  ;;  %v354_v14 = vadd.f32 %v1575_v41, %v353_v9  ;;  %v458_v24 = vmax.f32 %v362_v16, 0.0  ;;  %v490_v63 = vpack.c.bf16 %v469_v58, %v468_v56  ;;  %1274 = vmatprep.subr.bf16.mxu0 %v1375_v13 }
 0x131   :  { %v1195_v12 = vpop.f32.mrf.mxu0  ;;  %v1211_v31 = vpop.f32.mrf.mxu1  ;;  %v418_v57 = vadd.f32 %v1575_v41, %v417_v21  ;;  %v471_v6 = vmax.f32 %v413_v43, 0.0  ;;  %1275 = vmatpush3.bf16.msra.mxu0 %v1375_v13 }
 0x132   :  { %v365_v15 = vadd.f32 %v1195_v12, %v1575_v41  ;;  %1236 = vmatprep.mubr.bf16.mxu1 %v482_v10  ;;  %v456_v22 = vmax.f32 %v354_v14, 0.0  ;;  %v429_v12 = vadd.f32 %v1211_v31, %v1575_v41 }
 0x133   :  { %v356_v17 = vpop.f32.mrf.mxu0  ;;  %1237 = vmatmul.mubr.bf16.gmra.mxu1 %v483_v11  ;;  %v420_v40 = vpop.f32.mrf.mxu1  ;;  %v472_v3 = vmax.f32 %v418_v57, 0.0  ;;  %v491_v11 = vpack.c.bf16 %v471_v6, %v470_v5 }
 0x134   :  { %v357_v18 = vadd.f32 %v1575_v41, %v356_v17  ;;  %v459_v19 = vmax.f32 %v365_v15, 0.0  ;;  %v421_v0 = vadd.f32 %v1575_v41, %v420_v40  ;;  %v474_v15 = vmax.f32 %v426_v52, 0.0 }
 0x135   :  { %v1198_v20 = vpop.f32.mrf.mxu0  ;;  %v1214_v55 = vpop.f32.mrf.mxu1  ;;  %v475_v16 = vmax.f32 %v429_v12, 0.0 }
 0x136   :  { %v457_v23 = vmax.f32 %v357_v18, 0.0  ;;  %v485_v29 = vpack.c.bf16 %v459_v19, %v458_v24  ;;  %v378_v34 = vadd.f32 %v1198_v20, %v1575_v41  ;;  %v473_v4 = vmax.f32 %v421_v0, 0.0  ;;  %v1376_v24 = vld [vmem:[#allocation8 + $0x8] sm:$0xff]  }
 0x137   :  { %v369_v25 = vpop.f32.mrf.mxu0  ;;  %v433_v62 = vpop.f32.mrf.mxu1  ;;  %v493_v18 = vpack.c.bf16 %v475_v16, %v474_v15  ;;  %v442_v19 = vadd.f32 %v1214_v55, %v1575_v41  ;;  %1276 = vmatprep.subr.bf16.mxu0 %v1376_v24 }
 0x138   :  { %v484_v26 = vpack.c.bf16 %v457_v23, %v456_v22  ;;  %v370_v32 = vadd.f32 %v1575_v41, %v369_v25  ;;  %v462_v46 = vmax.f32 %v378_v34, 0.0  ;;  %v492_v8 = vpack.c.bf16 %v473_v4, %v472_v3  ;;  %1277 = vmatpush3.bf16.msra.mxu0 %v1376_v24  ;;  %v1377_v25 = vld [vmem:[#allocation8] sm:$0xff]  }
 0x139   :  { %v1199_v30 = vpop.f32.mrf.mxu0  ;;  %v1215_v2 = vpop.f32.mrf.mxu1  ;;  %v434_v9 = vadd.f32 %v1575_v41, %v433_v62  ;;  %v478_v21 = vmax.f32 %v442_v19, 0.0  ;;  %1278 = vmatprep.subr.bf16.mxu0 %v1377_v25 }
 0x13a   :  { %v381_v33 = vadd.f32 %v1199_v30, %v1575_v41  ;;  %1240 = vmatprep.mubr.bf16.mxu1 %v484_v26  ;;  %v460_v44 = vmax.f32 %v370_v32, 0.0  ;;  %v445_v20 = vadd.f32 %v1215_v2, %v1575_v41 }
 0x13b   :  { %v372_v35 = vpop.f32.mrf.mxu0  ;;  %1241 = vmatmul.mubr.bf16.gmra.mxu1 %v485_v29  ;;  %v436_v7 = vpop.f32.mrf.mxu1  ;;  %v476_v61 = vmax.f32 %v434_v9, 0.0 }
 0x13c   :  { %v373_v37 = vadd.f32 %v1575_v41, %v372_v35  ;;  %v463_v42 = vmax.f32 %v381_v33, 0.0  ;;  %v437_v10 = vadd.f32 %v1575_v41, %v436_v7  ;;  %v479_v22 = vmax.f32 %v445_v20, 0.0  ;;  %1279 = vmatpush3.bf16.msra.mxu0 %v1377_v25 }
 0x13e   :  { %v461_v45 = vmax.f32 %v373_v37, 0.0  ;;  %v487_v53 = vpack.c.bf16 %v463_v42, %v462_v46  ;;  %v477_v14 = vmax.f32 %v437_v10, 0.0  ;;  %v495_v23 = vpack.c.bf16 %v479_v22, %v478_v21 }
 0x140   :  { %v486_v47 = vpack.c.bf16 %v461_v45, %v460_v44  ;;  %v494_v17 = vpack.c.bf16 %v477_v14, %v476_v61 }
 0x142   :  { %1244 = vmatprep.mubr.bf16.mxu1 %v486_v47 }
 0x143   :  { %1245 = vmatmul.mubr.bf16.gmra.mxu1 %v487_v53 }
 0x144   :  { %1248 = vmatprep.mubr.bf16.mxu1 %v488_v48 }
 0x14b   :  { %1249 = vmatmul.mubr.bf16.gmra.mxu1 %v489_v1 }
 0x14c   :  { %1252 = vmatprep.mubr.bf16.mxu1 %v490_v63 }
 0x153   :  { %1253 = vmatmul.mubr.bf16.gmra.mxu1 %v491_v11 }
 0x154   :  { %1256 = vmatprep.mubr.bf16.mxu1 %v492_v8 }
 0x15b   :  { %1257 = vmatmul.mubr.bf16.gmra.mxu1 %v493_v18 }
 0x15c   :  { %1260 = vmatprep.mubr.bf16.mxu1 %v494_v17 }
 0x163   :  { %1261 = vmatmul.mubr.bf16.gmra.mxu1 %v495_v23 }
 0x1eb   :  { %v1234_v26 = vpop.f32.mrf.mxu1 }
 0x1ec   :  { %v607_v31 = vadd.f32 %v1234_v26, %v1622_v28 }
 0x1ed   :  { %v598_v27 = vpop.f32.mrf.mxu1 }
 0x1ee   :  { %v599_v29 = vadd.f32 %v1622_v28, %v598_v27  ;;  %v727_v39 = vmax.f32 %v607_v31, 0.0 }
 0x1ef   :  { %v1235_v41 = vpop.f32.mrf.mxu1 }
 0x1f0   :  { %v610_v30 = vadd.f32 %v1235_v41, %v1622_v28  ;;  %v725_v36 = vmax.f32 %v599_v29, 0.0 }
 0x1f1   :  { %v601_v32 = vpop.f32.mrf.mxu1 }
 0x1f2   :  { %v602_v33 = vadd.f32 %v1622_v28, %v601_v32  ;;  %v728_v34 = vmax.f32 %v610_v30, 0.0 }
 0x1f3   :  { %v1238_v35 = vpop.f32.mrf.mxu1 }
 0x1f4   :  { %v726_v37 = vmax.f32 %v602_v33, 0.0  ;;  %v758_v44 = vpack.c.bf16 %v728_v34, %v727_v39  ;;  %v623_v48 = vadd.f32 %v1238_v35, %v1622_v28 }
 0x1f5   :  { %v614_v42 = vpop.f32.mrf.mxu1 }
 0x1f6   :  { %v757_v40 = vpack.c.bf16 %v726_v37, %v725_v36  ;;  %v615_v46 = vadd.f32 %v1622_v28, %v614_v42  ;;  %v731_v56 = vmax.f32 %v623_v48, 0.0 }
 0x1f7   :  { %v1239_v45 = vpop.f32.mrf.mxu1 }
 0x1f8   :  { %v626_v47 = vadd.f32 %v1239_v45, %v1622_v28  ;;  %1280 = vmatprep.mubr.bf16.mxu0 %v757_v40  ;;  %v729_v54 = vmax.f32 %v615_v46, 0.0 }
 0x1f9   :  { %v617_v49 = vpop.f32.mrf.mxu1  ;;  %1281 = vmatmul.mubr.bf16.vlgmr.msra.gmra.mxu0 %v758_v44 }
 0x1fa   :  { %v618_v50 = vadd.f32 %v1622_v28, %v617_v49  ;;  %v732_v51 = vmax.f32 %v626_v47, 0.0 }
 0x1fb   :  { %v1242_v53 = vpop.f32.mrf.mxu1 }
 0x1fc   :  { %v730_v55 = vmax.f32 %v618_v50, 0.0  ;;  %v760_v60 = vpack.c.bf16 %v732_v51, %v731_v56  ;;  %v639_v0 = vadd.f32 %v1242_v53, %v1622_v28 }
 0x1fd   :  { %v630_v58 = vpop.f32.mrf.mxu1 }
 0x1fe   :  { %v759_v59 = vpack.c.bf16 %v730_v55, %v729_v54  ;;  %v631_v63 = vadd.f32 %v1622_v28, %v630_v58  ;;  %v735_v5 = vmax.f32 %v639_v0, 0.0 }
 0x1ff   :  { %v1243_v62 = vpop.f32.mrf.mxu1 }
 0x200   :  { %v642_v57 = vadd.f32 %v1243_v62, %v1622_v28  ;;  %1284 = vmatprep.mubr.bf16.mxu0 %v759_v59  ;;  %v733_v3 = vmax.f32 %v631_v63, 0.0 }
 0x201   :  { %v633_v1 = vpop.f32.mrf.mxu1  ;;  %1285 = vmatmul.mubr.bf16.gmra.mxu0 %v760_v60 }
 0x202   :  { %v634_v38 = vadd.f32 %v1622_v28, %v633_v1  ;;  %v736_v43 = vmax.f32 %v642_v57, 0.0 }
 0x203   :  { %v1246_v2 = vpop.f32.mrf.mxu1 }
 0x204   :  { %v734_v4 = vmax.f32 %v634_v38, 0.0  ;;  %v762_v8 = vpack.c.bf16 %v736_v43, %v735_v5  ;;  %v655_v52 = vadd.f32 %v1246_v2, %v1622_v28 }
 0x205   :  { %v646_v6 = vpop.f32.mrf.mxu1 }
 0x206   :  { %v761_v7 = vpack.c.bf16 %v734_v4, %v733_v3  ;;  %v647_v10 = vadd.f32 %v1622_v28, %v646_v6  ;;  %v739_v18 = vmax.f32 %v655_v52, 0.0 }
 0x207   :  { %v1247_v9 = vpop.f32.mrf.mxu1 }
 0x208   :  { %v658_v11 = vadd.f32 %v1247_v9, %v1622_v28  ;;  %1288 = vmatprep.mubr.bf16.mxu0 %v761_v7  ;;  %v737_v16 = vmax.f32 %v647_v10, 0.0 }
 0x209   :  { %v649_v12 = vpop.f32.mrf.mxu1  ;;  %1289 = vmatmul.mubr.bf16.gmra.mxu0 %v762_v8 }
 0x20a   :  { %v650_v61 = vadd.f32 %v1622_v28, %v649_v12  ;;  %v740_v14 = vmax.f32 %v658_v11, 0.0 }
 0x20b   :  { %v1250_v15 = vpop.f32.mrf.mxu1 }
 0x20c   :  { %v738_v17 = vmax.f32 %v650_v61, 0.0  ;;  %v764_v21 = vpack.c.bf16 %v740_v14, %v739_v18  ;;  %v671_v24 = vadd.f32 %v1250_v15, %v1622_v28  ;;  %v1656_v61 = vld [vmem:[#allocation10 + $0x2] ss:$0 sm:$0xff] }
 0x20d   :  { %v662_v19 = vpop.f32.mrf.mxu1 }
 0x20e   :  { %v763_v20 = vpack.c.bf16 %v738_v17, %v737_v16  ;;  %v663_v23 = vadd.f32 %v1622_v28, %v662_v19  ;;  %v743_v31 = vmax.f32 %v671_v24, 0.0 }
 0x20f   :  { %v1251_v22 = vpop.f32.mrf.mxu1 }
 0x210   :  { %v674_v13 = vadd.f32 %v1251_v22, %v1622_v28  ;;  %1292 = vmatprep.mubr.bf16.mxu0 %v763_v20  ;;  %v741_v29 = vmax.f32 %v663_v23, 0.0 }
 0x211   :  { %v665_v25 = vpop.f32.mrf.mxu1  ;;  %1293 = vmatmul.mubr.bf16.gmra.mxu0 %v764_v21 }
 0x212   :  { %v666_v26 = vadd.f32 %v1622_v28, %v665_v25  ;;  %v744_v27 = vmax.f32 %v674_v13, 0.0 }
 0x213   :  { %v1254_v41 = vpop.f32.mrf.mxu1 }
 0x214   :  { %v742_v30 = vmax.f32 %v666_v26, 0.0  ;;  %v766_v34 = vpack.c.bf16 %v744_v27, %v743_v31  ;;  %v687_v39 = vadd.f32 %v1254_v41, %v1622_v28 }
 0x215   :  { %v678_v32 = vpop.f32.mrf.mxu1 }
 0x216   :  { %v765_v33 = vpack.c.bf16 %v742_v30, %v741_v29  ;;  %v679_v36 = vadd.f32 %v1622_v28, %v678_v32  ;;  %v747_v48 = vmax.f32 %v687_v39, 0.0 }
 0x217   :  { %v1255_v35 = vpop.f32.mrf.mxu1 }
 0x218   :  { %v690_v37 = vadd.f32 %v1255_v35, %v1622_v28  ;;  %1296 = vmatprep.mubr.bf16.mxu0 %v765_v33  ;;  %v745_v46 = vmax.f32 %v679_v36, 0.0 }
 0x219   :  { %v681_v42 = vpop.f32.mrf.mxu1  ;;  %1297 = vmatmul.mubr.bf16.gmra.mxu0 %v766_v34 }
 0x21a   :  { %v682_v40 = vadd.f32 %v1622_v28, %v681_v42  ;;  %v748_v44 = vmax.f32 %v690_v37, 0.0 }
 0x21b   :  { %v1258_v45 = vpop.f32.mrf.mxu1 }
 0x21c   :  { %v746_v47 = vmax.f32 %v682_v40, 0.0  ;;  %v768_v51 = vpack.c.bf16 %v748_v44, %v747_v48  ;;  %v703_v56 = vadd.f32 %v1258_v45, %v1622_v28 }
 0x21d   :  { %v694_v49 = vpop.f32.mrf.mxu1 }
 0x21e   :  { %v767_v50 = vpack.c.bf16 %v746_v47, %v745_v46  ;;  %v695_v54 = vadd.f32 %v1622_v28, %v694_v49  ;;  %v751_v0 = vmax.f32 %v703_v56, 0.0 }
 0x21f   :  { %v1259_v53 = vpop.f32.mrf.mxu1 }
 0x220   :  { %v706_v55 = vadd.f32 %v1259_v53, %v1622_v28  ;;  %1300 = vmatprep.mubr.bf16.mxu0 %v767_v50  ;;  %v749_v63 = vmax.f32 %v695_v54, 0.0 }
 0x221   :  { %v697_v58 = vpop.f32.mrf.mxu1  ;;  %1301 = vmatmul.mubr.bf16.gmra.mxu0 %v768_v51 }
 0x222   :  { %v698_v59 = vadd.f32 %v1622_v28, %v697_v58  ;;  %v752_v60 = vmax.f32 %v706_v55, 0.0 }
 0x223   :  { %v1262_v62 = vpop.f32.mrf.mxu1 }
 0x224   :  { %v750_v57 = vmax.f32 %v698_v59, 0.0  ;;  %v770_v43 = vpack.c.bf16 %v752_v60, %v751_v0  ;;  %v719_v5 = vadd.f32 %v1262_v62, %v1622_v28 }
 0x225   :  { %v710_v1 = vpop.f32.mrf.mxu1 }
 0x226   :  { %v769_v38 = vpack.c.bf16 %v750_v57, %v749_v63  ;;  %v711_v3 = vadd.f32 %v1622_v28, %v710_v1  ;;  %v755_v11 = vmax.f32 %v719_v5, 0.0 }
 0x227   :  { %v1263_v2 = vpop.f32.mrf.mxu1 }
 0x228   :  { %v722_v4 = vadd.f32 %v1263_v2, %v1622_v28  ;;  %1304 = vmatprep.mubr.bf16.mxu0 %v769_v38  ;;  %v753_v9 = vmax.f32 %v711_v3, 0.0 }
 0x229   :  { %v713_v6 = vpop.f32.mrf.mxu1  ;;  %1305 = vmatmul.mubr.bf16.gmra.mxu0 %v770_v43 }
 0x22a   :  { %v714_v7 = vadd.f32 %v1622_v28, %v713_v6  ;;  %v756_v8 = vmax.f32 %v722_v4, 0.0 }
 0x22c   :  { %v754_v10 = vmax.f32 %v714_v7, 0.0  ;;  %v772_v12 = vpack.c.bf16 %v756_v8, %v755_v11 }
 0x22e   :  { %v771_v52 = vpack.c.bf16 %v754_v10, %v753_v9 }
 0x230   :  { %1308 = vmatprep.mubr.bf16.mxu0 %v771_v52 }
 0x231   :  { %1309 = vmatmul.mubr.bf16.gmra.mxu0 %v772_v12 }
 0x2b9   :  { %v1282_v14 = vpop.f32.mrf.mxu0 }
 0x2ba   :  { %v884_v15 = vadd.f32 %v1282_v14, %v1656_v61 }
 0x2bb   :  { %v875_v16 = vpop.f32.mrf.mxu0 }
 0x2bc   :  { %1004 = vst [vmem:[#allocation11 + $0x10] sm:$0xff] %v884_v15  ;;  %v876_v17 = vadd.f32 %v1656_v61, %v875_v16 }
 0x2bd   :  { %v1283_v18 = vpop.f32.mrf.mxu0 }
 0x2be   :  { %1002 = vst [vmem:[#allocation11] sm:$0xff] %v876_v17  ;;  %v887_v28 = vadd.f32 %v1283_v18, %v1656_v61 }
 0x2bf   :  { %v878_v19 = vpop.f32.mrf.mxu0 }
 0x2c0   :  { %1005 = vst [vmem:[#allocation11 + $0x18] sm:$0xff] %v887_v28  ;;  %v879_v20 = vadd.f32 %v1656_v61, %v878_v19 }
 0x2c1   :  { %v1286_v21 = vpop.f32.mrf.mxu0 }
 0x2c2   :  { %1003 = vst [vmem:[#allocation11 + $0x8] sm:$0xff] %v879_v20  ;;  %v900_v22 = vadd.f32 %v1286_v21, %v1656_v61 }
 0x2c3   :  { %v891_v23 = vpop.f32.mrf.mxu0 }
 0x2c4   :  { %1008 = vst [vmem:[#allocation11 + $0x30] sm:$0xff] %v900_v22  ;;  %v892_v13 = vadd.f32 %v1656_v61, %v891_v23 }
 0x2c5   :  { %v1287_v24 = vpop.f32.mrf.mxu0 }
 0x2c6   :  { %1006 = vst [vmem:[#allocation11 + $0x20] sm:$0xff] %v892_v13  ;;  %v903_v25 = vadd.f32 %v1287_v24, %v1656_v61 }
 0x2c7   :  { %v894_v26 = vpop.f32.mrf.mxu0 }
 0x2c8   :  { %1009 = vst [vmem:[#allocation11 + $0x38] sm:$0xff] %v903_v25  ;;  %v895_v27 = vadd.f32 %v1656_v61, %v894_v26 }
 0x2c9   :  { %v1290_v41 = vpop.f32.mrf.mxu0 }
 0x2ca   :  { %1007 = vst [vmem:[#allocation11 + $0x28] sm:$0xff] %v895_v27  ;;  %v916_v29 = vadd.f32 %v1290_v41, %v1656_v61 }
 0x2cb   :  { %v907_v30 = vpop.f32.mrf.mxu0 }
 0x2cc   :  { %1012 = vst [vmem:[#allocation11 + $0x50] sm:$0xff] %v916_v29  ;;  %v908_v31 = vadd.f32 %v1656_v61, %v907_v30 }
 0x2cd   :  { %v1291_v32 = vpop.f32.mrf.mxu0 }
 0x2ce   :  { %1010 = vst [vmem:[#allocation11 + $0x40] sm:$0xff] %v908_v31  ;;  %v919_v33 = vadd.f32 %v1291_v32, %v1656_v61 }
 0x2cf   :  { %v910_v34 = vpop.f32.mrf.mxu0 }
 0x2d0   :  { %1013 = vst [vmem:[#allocation11 + $0x58] sm:$0xff] %v919_v33  ;;  %v911_v35 = vadd.f32 %v1656_v61, %v910_v34 }
 0x2d1   :  { %v1294_v36 = vpop.f32.mrf.mxu0 }
 0x2d2   :  { %1011 = vst [vmem:[#allocation11 + $0x48] sm:$0xff] %v911_v35  ;;  %v932_v37 = vadd.f32 %v1294_v36, %v1656_v61 }
 0x2d3   :  { %v923_v39 = vpop.f32.mrf.mxu0 }
 0x2d4   :  { %1016 = vst [vmem:[#allocation11 + $0x70] sm:$0xff] %v932_v37  ;;  %v924_v42 = vadd.f32 %v1656_v61, %v923_v39 }
 0x2d5   :  { %v1295_v40 = vpop.f32.mrf.mxu0 }
 0x2d6   :  { %1014 = vst [vmem:[#allocation11 + $0x60] sm:$0xff] %v924_v42  ;;  %v935_v44 = vadd.f32 %v1295_v40, %v1656_v61 }
 0x2d7   :  { %v926_v45 = vpop.f32.mrf.mxu0 }
 0x2d8   :  { %1017 = vst [vmem:[#allocation11 + $0x78] sm:$0xff] %v935_v44  ;;  %v927_v46 = vadd.f32 %v1656_v61, %v926_v45 }
 0x2d9   :  { %v1298_v47 = vpop.f32.mrf.mxu0 }
 0x2da   :  { %1015 = vst [vmem:[#allocation11 + $0x68] sm:$0xff] %v927_v46  ;;  %v948_v48 = vadd.f32 %v1298_v47, %v1656_v61 }
 0x2db   :  { %v939_v49 = vpop.f32.mrf.mxu0 }
 0x2dc   :  { %1020 = vst [vmem:[#allocation11 + $0x90] sm:$0xff] %v948_v48  ;;  %v940_v50 = vadd.f32 %v1656_v61, %v939_v49 }
 0x2dd   :  { %v1299_v51 = vpop.f32.mrf.mxu0 }
 0x2de   :  { %1018 = vst [vmem:[#allocation11 + $0x80] sm:$0xff] %v940_v50  ;;  %v951_v53 = vadd.f32 %v1299_v51, %v1656_v61 }
 0x2df   :  { %v942_v54 = vpop.f32.mrf.mxu0 }
 0x2e0   :  { %1021 = vst [vmem:[#allocation11 + $0x98] sm:$0xff] %v951_v53  ;;  %v943_v55 = vadd.f32 %v1656_v61, %v942_v54 }
 0x2e1   :  { %v1302_v56 = vpop.f32.mrf.mxu0 }
 0x2e2   :  { %1019 = vst [vmem:[#allocation11 + $0x88] sm:$0xff] %v943_v55  ;;  %v964_v58 = vadd.f32 %v1302_v56, %v1656_v61 }
 0x2e3   :  { %v955_v59 = vpop.f32.mrf.mxu0 }
 0x2e4   :  { %1024 = vst [vmem:[#allocation11 + $0xb0] sm:$0xff] %v964_v58  ;;  %v956_v60 = vadd.f32 %v1656_v61, %v955_v59 }
 0x2e5   :  { %v1303_v62 = vpop.f32.mrf.mxu0 }
 0x2e6   :  { %1022 = vst [vmem:[#allocation11 + $0xa0] sm:$0xff] %v956_v60  ;;  %v967_v63 = vadd.f32 %v1303_v62, %v1656_v61 }
 0x2e7   :  { %v958_v57 = vpop.f32.mrf.mxu0 }
 0x2e8   :  { %1025 = vst [vmem:[#allocation11 + $0xb8] sm:$0xff] %v967_v63  ;;  %v959_v0 = vadd.f32 %v1656_v61, %v958_v57 }
 0x2e9   :  { %v1306_v1 = vpop.f32.mrf.mxu0 }
 0x2ea   :  { %1023 = vst [vmem:[#allocation11 + $0xa8] sm:$0xff] %v959_v0  ;;  %v980_v38 = vadd.f32 %v1306_v1, %v1656_v61 }
 0x2eb   :  { %v971_v43 = vpop.f32.mrf.mxu0 }
 0x2ec   :  { %1028 = vst [vmem:[#allocation11 + $0xd0] sm:$0xff] %v980_v38  ;;  %v972_v2 = vadd.f32 %v1656_v61, %v971_v43 }
 0x2ed   :  { %v1307_v3 = vpop.f32.mrf.mxu0 }
 0x2ee   :  { %1026 = vst [vmem:[#allocation11 + $0xc0] sm:$0xff] %v972_v2  ;;  %v983_v4 = vadd.f32 %v1307_v3, %v1656_v61 }
 0x2ef   :  { %v974_v5 = vpop.f32.mrf.mxu0 }
 0x2f0   :  { %1029 = vst [vmem:[#allocation11 + $0xd8] sm:$0xff] %v983_v4  ;;  %v975_v6 = vadd.f32 %v1656_v61, %v974_v5 }
 0x2f1   :  { %v1310_v7 = vpop.f32.mrf.mxu0 }
 0x2f2   :  { %1027 = vst [vmem:[#allocation11 + $0xc8] sm:$0xff] %v975_v6  ;;  %v996_v8 = vadd.f32 %v1310_v7, %v1656_v61 }
 0x2f3   :  { %v987_v9 = vpop.f32.mrf.mxu0 }
 0x2f4   :  { %1032 = vst [vmem:[#allocation11 + $0xf0] sm:$0xff] %v996_v8  ;;  %v988_v10 = vadd.f32 %v1656_v61, %v987_v9 }
 0x2f5   :  { %v1311_v11 = vpop.f32.mrf.mxu0 }
 0x2f6   :  { %1030 = vst [vmem:[#allocation11 + $0xe0] sm:$0xff] %v988_v10  ;;  %v999_v52 = vadd.f32 %v1311_v11, %v1656_v61 }
 0x2f7   :  { %v990_v12 = vpop.f32.mrf.mxu0 }
 0x2f8   :  { %1033 = vst [vmem:[#allocation11 + $0xf8] sm:$0xff] %v999_v52  ;;  %v991_v14 = vadd.f32 %v1656_v61, %v990_v12 }
 0x2fa   :  { %1031 = vst [vmem:[#allocation11 + $0xe8] sm:$0xff] %v991_v14 }
 0x2fb   :  { %1489 = shalt.err (!%p1486_p1)
}
 0x2fc   :  { %s1514_s18 = smov 128   ;;  %s1515_s19 = smov 8  }
 0x2fd   :  { %1045 = dma.vmem_to_hbm [thread:$0]  %s1040_s4, 4096, %s1698_s5, [#allocation4], %s1514_s18, %s1514_s18, %s1515_s19  }
 0x2fe   :  { %1504 = dma.done.wait [#allocation4], 4096  }
 0x2ff   :  { %1505 = vsyncadd [#allocation4], 4294963200 }
 0x300   :  { %1049 = vsyncpa [#allocation3], 1 }
 0x301   :  { %1050 = vsyncpa [#allocation6], 1 }
 0x302   :  { %1051 = vsyncpa [#allocation9], 1 }
 0x303   :  { %1052 = vsyncpa [#allocation4], 1 }

</bundles_post_ra>
